<compile_context>
chip_gen: v7x
topology: tpu7x:2x2x1
jax: 0.10.0
libtpu: 0.0.40
codegen_flags: <defaults>
</compile_context>

<pallas_src>
import jax
import jax.numpy as jnp
import numpy as np
from jax import lax
from jax.experimental import pallas as pl
from jax.experimental.pallas import tpu as pltpu

PAD_IDX = 0      # preprocess.Vocab_Pad.PAD
_EPS = 1e-6


def _round_up(x, m):
    return ((x + m - 1) // m) * m


def _pick_div(n, candidates):
    for c in candidates:
        if c <= n and n % c == 0:
            return c
    return n


def _vmem_budget_bytes():
    """Generation-aware scoped-VMEM budget: ~75% of physical VMEM.

    ~48 MiB on v7x (64 MiB parts), ~96 MiB on v5e/v6e (128 MiB parts)."""
    cap = 128 << 20
    try:
        cap = int(getattr(pltpu.get_tpu_info(), "vmem_capacity_bytes", cap))
    except Exception:
        pass
    return max(32 << 20, int(0.75 * cap))


# --------------------------------------------------------------------------
# Kernel 1: (1, D) mean / inv-std of the vocab-frequency-weighted table.
#           Grid (D-tiles [parallel], V-tiles [arbitrary, innermost]);
#           the output blocks double as streaming accumulators.
# --------------------------------------------------------------------------
def _stats_kernel(emb_ref, w_ref, mean_ref, rstd_ref):
    k = pl.program_id(1)                       # vocab-tile index (innermost)

    @pl.when(k == 0)
    def _():
        mean_ref[...] = jnp.zeros_like(mean_ref)
        rstd_ref[...] = jnp.zeros_like(rstd_ref)

    emb = emb_ref[...].astype(jnp.float32)     # (tv, td)
    w = w_ref[...]                             # (1, tv), pre-normalized in wrapper
    mean_ref[...] += jnp.dot(w, emb, preferred_element_type=jnp.float32)
    rstd_ref[...] += jnp.dot(w, emb * emb, preferred_element_type=jnp.float32)

    @pl.when(k == pl.num_programs(1) - 1)
    def _():
        mean = mean_ref[...]
        # var = E[x^2] - mean^2 (f32 accumulation + eps; clamp for safety).
        var = jnp.maximum(rstd_ref[...] - mean * mean, 0.0)
        rstd_ref[...] = 1.0 / jnp.sqrt(_EPS + var)


def embedding_stats(emb, vocab_freqs):
    """Returns (mean, inv_std), each (1, D) float32, without writing E_norm."""
    V, D = emb.shape
    budget = _vmem_budget_bytes()
    esize = emb.dtype.itemsize
    td = _pick_div(D, (512, 256, 128))
    # Vocab tile: largest multiple of 128 dividing V whose double-buffered slab
    # stays well inside the VMEM budget; tiny/indivisible vocabs use one slab.
    tv = V
    for cand in (8192, 4096, 2048, 1024, 512, 256, 128):
        if V % cand == 0 and 2 * cand * td * esize <= budget // 2:
            tv = cand
            break
    # TODO(synk): pad-with-zero-weight path for vocab sizes not divisible by 128.

    # Frequency normalization hoisted out of the kernel (done once, not per tile).
    w_row = (vocab_freqs / jnp.sum(vocab_freqs)).reshape(1, V).astype(jnp.float32)

    mean, rstd = pl.pallas_call(
        _stats_kernel,
        out_shape=(jax.ShapeDtypeStruct((1, D), jnp.float32),
                   jax.ShapeDtypeStruct((1, D), jnp.float32)),
        grid=(D // td, V // tv),
        in_specs=[
            pl.BlockSpec((tv, td), lambda j, k: (k, j)),
            pl.BlockSpec((1, tv), lambda j, k: (0, k)),
        ],
        out_specs=[
            pl.BlockSpec((1, td), lambda j, k: (0, j)),
            pl.BlockSpec((1, td), lambda j, k: (0, j)),
        ],
        compiler_params=pltpu.CompilerParams(
            dimension_semantics=("parallel", "arbitrary"),
            vmem_limit_bytes=budget),
    )(emb, w_row)
    return mean, rstd


# --------------------------------------------------------------------------
# Kernel 2a: VMEM-resident-table fast path.
#            Table/mean/rstd loaded once (constant index_map); rows gathered
#            with a one-hot x table MXU matmul (no per-row HBM DMAs).
# --------------------------------------------------------------------------
def _lookup_vmem_kernel(ids_ref, tab_ref, mean_ref, rstd_ref, out_ref):
    tb = out_ref.shape[0]
    V = tab_ref.shape[0]
    ids = ids_ref[...]                                            # (tb, 1) int32
    iota = lax.broadcasted_iota(jnp.int32, (tb, V), 1)
    # Out-of-range ids give an all-zero row (nn.Embedding would raise instead).
    onehot = (iota == ids).astype(jnp.float32)                    # (tb, V)
    rows = jnp.dot(onehot, tab_ref[...].astype(jnp.float32),
                   preferred_element_type=jnp.float32)            # (tb, D)
    out_ref[...] = ((rows - mean_ref[...]) * rstd_ref[...]).astype(out_ref.dtype)


# --------------------------------------------------------------------------
# Kernel 2b: HBM row-gather path (large tables).
#            Double-buffered per-row DMAs, one shared DMA semaphore per slot,
#            ids scalar-prefetched into SMEM (read before any semaphore wait).
# --------------------------------------------------------------------------
def _lookup_hbm_kernel(ids_ref, emb_hbm, mean_ref, rstd_ref, out_ref,
                       rows, sems):
    tb, D = out_ref.shape
    V = emb_hbm.shape[0]
    i = pl.program_id(0)
    nsteps = pl.num_programs(0)
    slot = i % 2

    def issue_block(blk, slot_):
        # Reads SMEM ids *before* any .wait() and enqueues tb single-row DMAs
        # that all signal one shared semaphore (paged-attention pattern).
        def body(t, carry):
            # PyTorch would raise on out-of-range ids; clamp so the DMA source
            # address is always in bounds.
            row = jnp.clip(ids_ref[blk * tb + t], 0, V - 1)
            pltpu.make_async_copy(
                emb_hbm.at[pl.ds(row, 1), :],
                rows.at[slot_, pl.ds(t, 1), :],
                sems.at[slot_]).start()
            return carry
        lax.fori_loop(0, tb, body, 0)

    def wait_block(slot_):
        # All tb copies share sems[slot_]; the per-copy wait amounts add up to
        # the total signalled, so this is semantics-agnostic and correct.
        def body(t, carry):
            pltpu.make_async_copy(
                emb_hbm.at[pl.ds(0, 1), :],
                rows.at[slot_, pl.ds(t, 1), :],
                sems.at[slot_]).wait()
            return carry
        lax.fori_loop(0, tb, body, 0)

    @pl.when(i == 0)
    def _():
        issue_block(0, 0)                 # prologue: current block

    @pl.when(i + 1 < nsteps)
    def _():
        issue_block(i + 1, 1 - slot)      # prefetch next block into other slot

    wait_block(slot)                      # block i's rows (issued last step)

    out_ref[...] = ((rows[slot].astype(jnp.float32) - mean_ref[...])
                    * rstd_ref[...]).astype(out_ref.dtype)


def embedding_lookup_normalized(word_ids, emb, mean, rstd, *, tb=256,
                                force_hbm_gather=False):
    B, S = word_ids.shape
    V, D = emb.shape
    N = B * S
    budget = _vmem_budget_bytes()
    esize = emb.dtype.itemsize

    # Token tile: large (amortizes per-step overhead and the mean/rstd
    # broadcast) but capped so double-buffered rows + out blocks fit the budget.
    tb = min(int(tb), max(8, (budget // 6) // max(1, D * esize)))
    tb = max(8, min(_round_up(tb, 8), _round_up(N, 8)))
    n_blocks = pl.cdiv(N, tb)
    n_pad = n_blocks * tb

    ids_flat = word_ids.reshape(N).astype(jnp.int32)
    if n_pad != N:
        # Only the tiny id vector is padded; the (N, D) output is written
        # directly (partial tail block is clipped) -> no post-kernel slice/copy.
        ids_flat = jnp.concatenate(
            [ids_flat, jnp.full((n_pad - N,), PAD_IDX, jnp.int32)])

    table_bytes = V * D * esize
    use_vmem_table = ((not force_hbm_gather)
                      and table_bytes <= budget // 3
                      and tb * V * 4 <= budget // 4)   # one-hot intermediate

    if use_vmem_table:
        out = pl.pallas_call(
            _lookup_vmem_kernel,
            out_shape=jax.ShapeDtypeStruct((N, D), emb.dtype),
            grid=(n_blocks,),
            in_specs=[
                pl.BlockSpec((tb, 1), lambda i: (i, 0)),      # ids
                pl.BlockSpec((V, D), lambda i: (0, 0)),       # table (resident)
                pl.BlockSpec((1, D), lambda i: (0, 0)),       # mean  (resident)
                pl.BlockSpec((1, D), lambda i: (0, 0)),       # rstd  (resident)
            ],
            out_specs=pl.BlockSpec((tb, D), lambda i: (i, 0)),
            compiler_params=pltpu.CompilerParams(
                dimension_semantics=("parallel",),
                vmem_limit_bytes=budget),
        )(ids_flat.reshape(n_pad, 1), emb, mean, rstd)
    else:
        out = pl.pallas_call(
            _lookup_hbm_kernel,
            out_shape=jax.ShapeDtypeStruct((N, D), emb.dtype),
            grid_spec=pltpu.PrefetchScalarGridSpec(
                num_scalar_prefetch=1,
                grid=(n_blocks,),
                in_specs=[
                    pl.BlockSpec(memory_space=pl.ANY),             # table in HBM
                    pl.BlockSpec((1, D), lambda i, ids: (0, 0)),   # mean
                    pl.BlockSpec((1, D), lambda i, ids: (0, 0)),   # rstd
                ],
                out_specs=pl.BlockSpec((tb, D), lambda i, ids: (i, 0)),
                scratch_shapes=[
                    pltpu.VMEM((2, tb, D), emb.dtype),             # row double-buffer
                    pltpu.SemaphoreType.DMA((2,)),                 # one sem per slot
                ]),
            compiler_params=pltpu.CompilerParams(
                # Cross-iteration DMA prefetch => this axis must stay serial.
                dimension_semantics=("arbitrary",),
                vmem_limit_bytes=budget),
        )(ids_flat, emb, mean, rstd)
    return out.reshape(B, S, D)


# --------------------------------------------------------------------------
# Embedder.forward equivalent (eval mode).
# --------------------------------------------------------------------------
def embedder_forward(word_ids, emb_weight, vocab_freqs,
                     normalize_embedding_flag=True, *, tb=256,
                     force_hbm_gather=False):
    _, D = emb_weight.shape
    if normalize_embedding_flag:
        mean, rstd = embedding_stats(emb_weight, vocab_freqs)
    else:
        mean = jnp.zeros((1, D), jnp.float32)
        rstd = jnp.ones((1, D), jnp.float32)
    word_embedding = embedding_lookup_normalized(
        word_ids, emb_weight, mean, rstd, tb=tb,
        force_hbm_gather=force_hbm_gather)
    # nn.Dropout / LockedDropout in eval mode == identity.
    # TODO(synk): training-mode word / locked dropout not implemented.
    return word_embedding


# --------------------------------------------------------------------------
# Pure-JAX reference (for sanity check).
# --------------------------------------------------------------------------
def _reference(word_ids, emb, vocab_freqs):
    w = (vocab_freqs / jnp.sum(vocab_freqs))[:, None]
    mean = jnp.sum(w * emb, axis=0, keepdims=True)
    var = jnp.sum(w * (emb - mean) ** 2, axis=0, keepdims=True)
    emb_n = (emb - mean) / jnp.sqrt(1e-6 + var)
    return emb_n[word_ids]


def _run_case(key, V, D, B, S, tb, force_hbm_gather=False):
    k_emb, k_freq, k_ids = jax.random.split(key, 3)
    emb_weight = jax.random.normal(k_emb, (V, D), dtype=jnp.float32)
    emb_weight = emb_weight.at[PAD_IDX].set(0.0)     # nn.Embedding padding_idx
    vocab_freqs = jax.random.uniform(k_freq, (V,), dtype=jnp.float32,
                                     minval=0.1, maxval=10.0)
    word_ids = jax.random.randint(k_ids, (B, S), 0, V, dtype=jnp.int32)

    out = embedder_forward(word_ids, emb_weight, vocab_freqs,
                           normalize_embedding_flag=True, tb=tb,
                           force_hbm_gather=force_hbm_gather)
    out = jax.block_until_ready(out)

    ref = _reference(word_ids, emb_weight, vocab_freqs)
    np.testing.assert_allclose(np.asarray(out), np.asarray(ref),
                               rtol=1e-4, atol=1e-5)
    assert out.shape == (B, S, D) and out.dtype == jnp.float32


if __name__ == "__main__":
    key = jax.random.PRNGKey(0)
    k0, k1, k2 = jax.random.split(key, 3)
    # VMEM-resident-table fast path, lane-dense D.
    _run_case(k0, V=512, D=128, B=2, S=8, tb=256)
    # Tiny full-block config; N=21 is not a multiple of tb -> clipped tail block.
    _run_case(k1, V=32, D=32, B=3, S=7, tb=16)
    # Forced HBM row-gather path: double-buffered per-row DMAs over 3 grid steps.
    _run_case(k2, V=2048, D=256, B=2, S=192, tb=128, force_hbm_gather=True)
    print("KERNEL_OK")
</pallas_src>

<mosaic_0001>
module attributes {stable_mosaic.version = 11 : i64} {
  func.func @_stats_kernel(%arg0: i32, %arg1: i32, %arg2: memref<512x128xf32, #tpu.memory_space<vmem>>, %arg3: memref<1x512xf32, #tpu.memory_space<vmem>>, %arg4: memref<1x128xf32, #tpu.memory_space<vmem>>, %arg5: memref<1x128xf32, #tpu.memory_space<vmem>>) attributes {dimension_semantics = [#tpu.dimension_semantics<parallel>, #tpu.dimension_semantics<arbitrary>], iteration_bounds = array<i64: 1, 1>, scalar_prefetch = 0 : i64, scratch_operands = 0 : i64, tpu.core_type = #tpu.core_type<tc>, window_params = [{transform_indices = @transform_0, window_bounds = array<i64: 512, 128>}, {transform_indices = @transform_1, window_bounds = array<i64: 1, 512>}, {transform_indices = @transform_2, window_bounds = array<i64: 1, 128>}, {transform_indices = @transform_3, window_bounds = array<i64: 1, 128>}]} {
    %c0_i32 = arith.constant 0 : i32
    %0 = arith.cmpi eq, %arg1, %c0_i32 : i32
    %1 = arith.extui %0 : i1 to i32
    %c0_i32_0 = arith.constant 0 : i32
    %2 = arith.cmpi ne, %1, %c0_i32_0 : i32
    scf.if %2 {
      %cst_15 = arith.constant 0.000000e+00 : f32
      %17 = vector.broadcast %cst_15 : f32 to vector<1x128xf32>
      %c0_16 = arith.constant 0 : index
      %c0_17 = arith.constant 0 : index
      %18 = vector.load %arg4[%c0_16, %c0_17] : memref<1x128xf32, #tpu.memory_space<vmem>>, vector<1x128xf32>
      tpu.vector_store %arg4[%c0_16, %c0_17], %17 {strides = array<i32>} : memref<1x128xf32, #tpu.memory_space<vmem>>, vector<1x128xf32>,
      %cst_18 = arith.constant 0.000000e+00 : f32
      %19 = vector.broadcast %cst_18 : f32 to vector<1x128xf32>
      %c0_19 = arith.constant 0 : index
      %c0_20 = arith.constant 0 : index
      %20 = vector.load %arg5[%c0_19, %c0_20] : memref<1x128xf32, #tpu.memory_space<vmem>>, vector<1x128xf32>
      tpu.vector_store %arg5[%c0_19, %c0_20], %19 {strides = array<i32>} : memref<1x128xf32, #tpu.memory_space<vmem>>, vector<1x128xf32>,
    } else {
    }
    %c0 = arith.constant 0 : index
    %c0_1 = arith.constant 0 : index
    %3 = vector.load %arg2[%c0, %c0_1] : memref<512x128xf32, #tpu.memory_space<vmem>>, vector<512x128xf32>
    %c0_2 = arith.constant 0 : index
    %c0_3 = arith.constant 0 : index
    %4 = vector.load %arg3[%c0_2, %c0_3] : memref<1x512xf32, #tpu.memory_space<vmem>>, vector<1x512xf32>
    %c0_4 = arith.constant 0 : index
    %c0_5 = arith.constant 0 : index
    %5 = vector.load %arg4[%c0_4, %c0_5] : memref<1x128xf32, #tpu.memory_space<vmem>>, vector<1x128xf32>
    %cst = arith.constant dense<0.000000e+00> : vector<1x128xf32>
    %6 = tpu.matmul %4, %3, %cst {dimension_numbers = #tpu.dot_dimension_numbers<[1], [0], [0], [1], [0, 0, 1, 1], [], []>} : vector<1x512xf32>, vector<512x128xf32>, vector<1x128xf32> -> vector<1x128xf32>
    %7 = arith.addf %5, %6 : vector<1x128xf32>
    %c0_6 = arith.constant 0 : index
    %c0_7 = arith.constant 0 : index
    %8 = vector.load %arg4[%c0_6, %c0_7] : memref<1x128xf32, #tpu.memory_space<vmem>>, vector<1x128xf32>
    tpu.vector_store %arg4[%c0_6, %c0_7], %7 {strides = array<i32>} : memref<1x128xf32, #tpu.memory_space<vmem>>, vector<1x128xf32>,
    %c0_8 = arith.constant 0 : index
    %c0_9 = arith.constant 0 : index
    %9 = vector.load %arg5[%c0_8, %c0_9] : memref<1x128xf32, #tpu.memory_space<vmem>>, vector<1x128xf32>
    %10 = arith.mulf %3, %3 : vector<512x128xf32>
    %cst_10 = arith.constant dense<0.000000e+00> : vector<1x128xf32>
    %11 = tpu.matmul %4, %10, %cst_10 {dimension_numbers = #tpu.dot_dimension_numbers<[1], [0], [0], [1], [0, 0, 1, 1], [], []>} : vector<1x512xf32>, vector<512x128xf32>, vector<1x128xf32> -> vector<1x128xf32>
    %12 = arith.addf %9, %11 : vector<1x128xf32>
    %c0_11 = arith.constant 0 : index
    %c0_12 = arith.constant 0 : index
    %13 = vector.load %arg5[%c0_11, %c0_12] : memref<1x128xf32, #tpu.memory_space<vmem>>, vector<1x128xf32>
    tpu.vector_store %arg5[%c0_11, %c0_12], %12 {strides = array<i32>} : memref<1x128xf32, #tpu.memory_space<vmem>>, vector<1x128xf32>,
    %c0_i32_13 = arith.constant 0 : i32
    %14 = arith.cmpi eq, %arg1, %c0_i32_13 : i32
    %15 = arith.extui %14 : i1 to i32
    %c0_i32_14 = arith.constant 0 : i32
    %16 = arith.cmpi ne, %15, %c0_i32_14 : i32
    scf.if %16 {
      %c0_15 = arith.constant 0 : index
      %c0_16 = arith.constant 0 : index
      %17 = vector.load %arg4[%c0_15, %c0_16] : memref<1x128xf32, #tpu.memory_space<vmem>>, vector<1x128xf32>
      %c0_17 = arith.constant 0 : index
      %c0_18 = arith.constant 0 : index
      %18 = vector.load %arg5[%c0_17, %c0_18] : memref<1x128xf32, #tpu.memory_space<vmem>>, vector<1x128xf32>
      %19 = arith.mulf %17, %17 : vector<1x128xf32>
      %20 = arith.subf %18, %19 : vector<1x128xf32>
      %cst_19 = arith.constant 0.000000e+00 : f32
      %21 = vector.broadcast %cst_19 : f32 to vector<1x128xf32>
      %22 = arith.maximumf %20, %21 : vector<1x128xf32>
      %cst_20 = arith.constant 9.99999997E-7 : f32
      %23 = vector.broadcast %cst_20 : f32 to vector<1x128xf32>
      %24 = arith.addf %23, %22 : vector<1x128xf32>
      %25 = math.sqrt %24 : vector<1x128xf32>
      %cst_21 = arith.constant 1.000000e+00 : f32
      %26 = vector.broadcast %cst_21 : f32 to vector<1x128xf32>
      %27 = arith.divf %26, %25 : vector<1x128xf32>
      %c0_22 = arith.constant 0 : index
      %c0_23 = arith.constant 0 : index
      %28 = vector.load %arg5[%c0_22, %c0_23] : memref<1x128xf32, #tpu.memory_space<vmem>>, vector<1x128xf32>
      tpu.vector_store %arg5[%c0_22, %c0_23], %27 {strides = array<i32>} : memref<1x128xf32, #tpu.memory_space<vmem>>, vector<1x128xf32>,
    } else {
    }
    return
  }
  func.func @transform_0(%arg0: i32, %arg1: i32) -> (i32, i32) {
    %c0_i32 = arith.constant 0 : i32
    return %arg1, %arg0 : i32, i32
  }
  func.func @transform_1(%arg0: i32, %arg1: i32) -> (i32, i32) {
    %c0_i32 = arith.constant 0 : i32
    %c0_i32_0 = arith.constant 0 : i32
    return %c0_i32, %arg1 : i32, i32
  }
  func.func @transform_2(%arg0: i32, %arg1: i32) -> (i32, i32) {
    %c0_i32 = arith.constant 0 : i32
    %c0_i32_0 = arith.constant 0 : i32
    return %c0_i32, %arg0 : i32, i32
  }
  func.func @transform_3(%arg0: i32, %arg1: i32) -> (i32, i32) {
    %c0_i32 = arith.constant 0 : i32
    %c0_i32_0 = arith.constant 0 : i32
    return %c0_i32, %arg0 : i32, i32
  }
}

</mosaic_0001>

<bundles_post_ra>
// kernel: tpu_custom_call.1
= control target key start
LH: loop header
LB: loop body
LE: loop exit
PB: predicated region body
PF: predicated region fallthrough
CT: control target
= control target key end

     0   :  { %9 = vsyncpa [#allocation3], 0  ;;  %s1324_s0 = inlined_call_operand.hbm [shape: f32[512,128], index: 0, kind: input, shape index: {}]   ;;  %s1325_s1 = inlined_call_operand.hbm [shape: f32[1,512], index: 1, kind: input, shape index: {}]   ;;  %s1326_s2 = inlined_call_operand.hbm [shape: f32[1,128], index: 2, kind: output, shape index: {0}]   ;;  %s1327_s3 = inlined_call_operand.hbm [shape: f32[1,128], index: 3, kind: output, shape index: {1}]  }
   0x1   :  { %10 = vsyncpa [#allocation6], 0 }
   0x2   :  { %11 = vsyncpa [#allocation4], 0 }
   0x3   :  { %12 = vsyncpa [#allocation9], 0  ;;  %s907_s12 = smov [#allocation2]   ;;  %s811_s16 = scalar_lea.hbm %s1324_s0, 8192 }
   0x4   :  { %s18_s13 = sshll.u32 %s907_s12, 4  ;;  %p812_p0 = scmp.ne.s32.totalorder %s1324_s0, %s811_s16  ;;  %s19_s13 = int_to_ptr.vmem [resolvable:$true] %s18_s13 }
   0x5   :  { %p815_p1 = scmp.lt.u32.totalorder %s811_s16, %s1324_s0 }
   0x7   :  { %p817_p2 = pnand %p815_p1, %p812_p0 }
   0x9   :  { %820 = shalt.err (!%p817_p2)
}
   0xa   :  { %s821_s21 = scalar_lea.vmem %s19_s13, 8192  ;;  %p826_p4 = scmp.lt.s32.totalorder %s19_s13, %s19_s13 }
   0xb   :  { %p822_p3 = scmp.ne.s32.totalorder %s19_s13, %s821_s21  ;;  %p827_p5 = scmp.lt.s32.totalorder %s821_s21, %s821_s21 }
   0xd   :  { %p828_p6 = por %p827_p5, %p826_p4 }
   0xf   :  { %p829_p7 = pnand %p828_p6, %p822_p3 }
  0x11   :  { %832 = shalt.err (!%p829_p7)
}
  0x12   :  { %s908_s22 = smov 128   ;;  %s909_s23 = smov 8  }
  0x13   :  { %24 = dma.hbm_to_vmem [thread:$0]  %s1324_s0, 8192, %s19_s13, [#allocation3], %s908_s22, %s908_s22, %s909_s23  }
  0x14   :  { %s910_s26 = smov [#allocation5]   ;;  %s833_s30 = scalar_lea.hbm %s1325_s1, 64 }
  0x15   :  { %s31_s27 = sshll.u32 %s910_s26, 4  ;;  %p834_p8 = scmp.ne.s32.totalorder %s1325_s1, %s833_s30  ;;  %s32_s27 = int_to_ptr.vmem [resolvable:$true] %s31_s27 }
  0x16   :  { %p837_p9 = scmp.lt.u32.totalorder %s833_s30, %s1325_s1 }
  0x18   :  { %p839_p10 = pnand %p837_p9, %p834_p8 }
  0x1a   :  { %842 = shalt.err (!%p839_p10)
}
  0x1b   :  { %s843_s8 = scalar_lea.vmem %s32_s27, 64  ;;  %p848_p12 = scmp.lt.s32.totalorder %s32_s27, %s32_s27 }
  0x1c   :  { %p844_p11 = scmp.ne.s32.totalorder %s32_s27, %s843_s8  ;;  %p849_p13 = scmp.lt.s32.totalorder %s843_s8, %s843_s8 }
  0x1e   :  { %p850_p0 = por %p849_p13, %p848_p12 }
  0x20   :  { %p851_p1 = pnand %p850_p0, %p844_p11 }
  0x22   :  { %854 = shalt.err (!%p851_p1)
}
  0x23   :  { %34 = dma.hbm_to_vmem [thread:$0]  %s1325_s1, 64, %s32_s27, [#allocation6]  }
  0x24   :  { %899 = dma.done.wait [#allocation3], 8192  }
  0x25   :  { %900 = vsyncadd [#allocation3], 4294959104 }
  0x26   :  { %901 = dma.done.wait [#allocation6], 64  }
  0x27   :  { %902 = vsyncadd [#allocation6], 4294967232  ;;  %v958_v0 = vld [vmem:[#allocation2 + $0x80] sm:$0xff]  ;;  %v960_v1 = vld [vmem:[#allocation2 + $0x88] sm:$0xff]  ;;  %v114_v47 = vlaneseq  ;;  %s912_s1 = smov [#allocation7]  }
  0x28   :  { %v962_v2 = vld [vmem:[#allocation2 + $0x180] sm:$0xff]  ;;  %v672_v3 = vpack.c.bf16 %v960_v1, %v958_v0  ;;  %v966_v4 = vld [vmem:[#allocation2 + $0x188] sm:$0xff]  ;;  %v980_v11 = vld [vmem:[#allocation2 + $0x90] sm:$0xff]  ;;  %s508_s10 = sshll.u32 %s912_s1, 4  ;;  %s509_s10 = int_to_ptr.vmem [resolvable:$true] %s508_s10 }
  0x29   :  { %v968_v5 = vld [vmem:[#allocation2] sm:$0xff]  ;;  %v970_v6 = vld [vmem:[#allocation2 + $0x8] sm:$0xff]  ;;  %v704_v7 = vpack.c.bf16 %v966_v4, %v962_v2  ;;  %v984_v13 = vld [vmem:[#allocation2 + $0x98] sm:$0xff]  ;;  %v1078_v61 = vshrl.u32 %v114_v47, 7  ;;  %s855_s11 = scalar_lea.vmem %s509_s10, 16  ;;  %s859_s12 = scalar_lea.vmem %s509_s10, 32 }
  0x2a   :  { %v674_v8 = vpack.c.bf16 %v970_v6, %v968_v5  ;;  %v976_v9 = vld [vmem:[#allocation2 + $0x100] sm:$0xff]  ;;  %v978_v10 = vld [vmem:[#allocation2 + $0x108] sm:$0xff]  ;;  %673 = vmatprep.subr.bf16.mxu0 %v672_v3  ;;  %v986_v14 = vld [vmem:[#allocation2 + $0x190] sm:$0xff]  ;;  %v676_v16 = vpack.c.bf16 %v984_v13, %v980_v11  ;;  %p856_p2 = scmp.ne.s32.totalorder %s509_s10, %s855_s11  ;;  %p860_p3 = scmp.lt.s32.totalorder %s509_s10, %s509_s10 }
  0x2b   :  { %v706_v12 = vpack.c.bf16 %v978_v10, %v976_v9  ;;  %v988_v15 = vld [vmem:[#allocation2 + $0x198] sm:$0xff]  ;;  %705 = vmatprep.subr.bf16.mxu1 %v704_v7  ;;  %v994_v18 = vld [vmem:[#allocation2 + $0x10] sm:$0xff]  ;;  %v1004_v23 = vld [vmem:[#allocation2 + $0xa0] sm:$0xff]  ;;  %p861_p4 = scmp.lt.s32.totalorder %s859_s12, %s855_s11 }
  0x2c   :  { %675 = vmatpush3.bf16.msra.mxu0 %v674_v8  ;;  %v708_v17 = vpack.c.bf16 %v988_v15, %v986_v14  ;;  %v996_v19 = vld [vmem:[#allocation2 + $0x18] sm:$0xff]  ;;  %v998_v20 = vld [vmem:[#allocation2 + $0x110] sm:$0xff]  ;;  %v1006_v24 = vld [vmem:[#allocation2 + $0xa8] sm:$0xff] }
  0x2d   :  { %707 = vmatpush3.bf16.msra.mxu1 %v706_v12  ;;  %v678_v21 = vpack.c.bf16 %v996_v19, %v994_v18  ;;  %v1002_v22 = vld [vmem:[#allocation2 + $0x118] sm:$0xff]  ;;  %677 = vmatprep.subr.bf16.mxu0 %v676_v16  ;;  %v1010_v26 = vld [vmem:[#allocation2 + $0x1a0] sm:$0xff]  ;;  %v1012_v27 = vld [vmem:[#allocation2 + $0x1a8] sm:$0xff]  ;;  %v680_v29 = vpack.c.bf16 %v1006_v24, %v1004_v23  ;;  %p862_p5 = por %p861_p4, %p860_p3 }
  0x2e   :  { %709 = vmatprep.subr.bf16.mxu1 %v708_v17  ;;  %v710_v25 = vpack.c.bf16 %v1002_v22, %v998_v20  ;;  %v1014_v28 = vld [vmem:[#allocation2 + $0x20] sm:$0xff]  ;;  %v712_v30 = vpack.c.bf16 %v1012_v27, %v1010_v26  ;;  %v1020_v31 = vld [vmem:[#allocation2 + $0x28] sm:$0xff]  ;;  %v1028_v35 = vld [vmem:[#allocation2 + $0xb0] sm:$0xff] }
  0x2f   :  { %v1022_v32 = vld [vmem:[#allocation2 + $0x120] sm:$0xff]  ;;  %v1024_v33 = vld [vmem:[#allocation2 + $0x128] sm:$0xff]  ;;  %v682_v34 = vpack.c.bf16 %v1020_v31, %v1014_v28  ;;  %v1030_v36 = vld [vmem:[#allocation2 + $0xb8] sm:$0xff]  ;;  %p863_p6 = pnand %p862_p5, %p856_p2 }
  0x30   :  { %679 = vmatpush3.bf16.msra.mxu0 %v678_v21  ;;  %v1032_v37 = vld [vmem:[#allocation2 + $0x1b0] sm:$0xff]  ;;  %v714_v38 = vpack.c.bf16 %v1024_v33, %v1022_v32  ;;  %v684_v39 = vpack.c.bf16 %v1030_v36, %v1028_v35  ;;  %v1038_v40 = vld [vmem:[#allocation2 + $0x1b8] sm:$0xff]  ;;  %v1050_v46 = vld [vmem:[#allocation2 + $0xc0] sm:$0xff] }
  0x31   :  { %711 = vmatpush3.bf16.msra.mxu1 %v710_v25  ;;  %681 = vmatprep.subr.bf16.mxu0 %v680_v29  ;;  %v1040_v41 = vld [vmem:[#allocation2 + $0x30] sm:$0xff]  ;;  %v1042_v42 = vld [vmem:[#allocation2 + $0x38] sm:$0xff]  ;;  %v716_v43 = vpack.c.bf16 %v1038_v40, %v1032_v37  ;;  %v1052_v48 = vld [vmem:[#allocation2 + $0xc8] sm:$0xff] }
  0x32   :  { %713 = vmatprep.subr.bf16.mxu1 %v712_v30  ;;  %v1046_v44 = vld [vmem:[#allocation2 + $0x130] sm:$0xff]  ;;  %v1048_v45 = vld [vmem:[#allocation2 + $0x138] sm:$0xff]  ;;  %v1054_v49 = vld [vmem:[#allocation2 + $0x1c0] sm:$0xff]  ;;  %v686_v51 = vpack.c.bf16 %v1042_v42, %v1040_v41  ;;  %v688_v53 = vpack.c.bf16 %v1052_v48, %v1050_v46 }
  0x33   :  { %v1056_v50 = vld [vmem:[#allocation2 + $0x1c8] sm:$0xff]  ;;  %v718_v52 = vpack.c.bf16 %v1048_v45, %v1046_v44  ;;  %v1064_v54 = vld [vmem:[#allocation2 + $0x40] sm:$0xff]  ;;  %v1074_v59 = vld [vmem:[#allocation2 + $0xd0] sm:$0xff] }
  0x34   :  { %683 = vmatpush3.bf16.msra.mxu0 %v682_v34  ;;  %v1066_v55 = vld [vmem:[#allocation2 + $0x48] sm:$0xff]  ;;  %v1068_v56 = vld [vmem:[#allocation2 + $0x140] sm:$0xff]  ;;  %v720_v57 = vpack.c.bf16 %v1056_v50, %v1054_v49  ;;  %v1076_v60 = vld [vmem:[#allocation2 + $0xd8] sm:$0xff]  ;;  %v120_v34 = vsub.s32 1, %v1078_v61 }
  0x35   :  { %715 = vmatpush3.bf16.msra.mxu1 %v714_v38  ;;  %685 = vmatprep.subr.bf16.mxu0 %v684_v39  ;;  %v1072_v58 = vld [vmem:[#allocation2 + $0x148] sm:$0xff]  ;;  %v1080_v62 = vld [vmem:[#allocation2 + $0x1d0] sm:$0xff]  ;;  %v1082_v63 = vld [vmem:[#allocation2 + $0x1d8] sm:$0xff]  ;;  %v690_v3 = vpack.c.bf16 %v1066_v55, %v1064_v54  ;;  %v692_v8 = vpack.c.bf16 %v1076_v60, %v1074_v59 }
  0x36   :  { %717 = vmatprep.subr.bf16.mxu1 %v716_v43  ;;  %1344 = vst [vmem:[#allocation14_spill] sm:$0xff] %v1080_v62  ;;  %1345 = vst [vmem:[#allocation15_spill] sm:$0xff] %v1082_v63  ;;  %v722_v7 = vpack.c.bf16 %v1072_v58, %v1068_v56  ;;  %v1090_v12 = vld [vmem:[#allocation2 + $0x50] sm:$0xff]  ;;  %v1092_v16 = vld [vmem:[#allocation2 + $0x58] sm:$0xff]  ;;  %v724_v21 = vpack.c.bf16 %v1082_v63, %v1080_v62  ;;  %v128_v43 = vsub.s32 3, %v1078_v61 }
  0x37   :  { %1346 = vst [vmem:[#allocation16_spill] sm:$0xff] %v1090_v12  ;;  %1347 = vst [vmem:[#allocation17_spill] sm:$0xff] %v1092_v16  ;;  %v1094_v17 = vld [vmem:[#allocation2 + $0x150] sm:$0xff]  ;;  %v1098_v25 = vld [vmem:[#allocation2 + $0x158] sm:$0xff]  ;;  %v694_v47 = vpack.c.bf16 %v1092_v16, %v1090_v12 }
  0x38   :  { %687 = vmatpush3.bf16.msra.mxu0 %v686_v51  ;;  %1348 = vst [vmem:[#allocation18_spill] sm:$0xff] %v1094_v17  ;;  %1349 = vst [vmem:[#allocation19_spill] sm:$0xff] %v1098_v25  ;;  %v1100_v29 = vld [vmem:[#allocation2 + $0xe0] sm:$0xff]  ;;  %v1102_v30 = vld [vmem:[#allocation2 + $0xe8] sm:$0xff] }
  0x39   :  { %719 = vmatpush3.bf16.msra.mxu1 %v718_v52  ;;  %689 = vmatprep.subr.bf16.mxu0 %v688_v53  ;;  %1350 = vst [vmem:[#allocation20_spill] sm:$0xff] %v1100_v29  ;;  %1351 = vst [vmem:[#allocation21_spill] sm:$0xff] %v1102_v30  ;;  %v1105_v38 = vld [vmem:[#allocation2 + $0x1e0] sm:$0xff]  ;;  %v1107_v39 = vld [vmem:[#allocation2 + $0x1e8] sm:$0xff]  ;;  %v726_v52 = vpack.c.bf16 %v1098_v25, %v1094_v17  ;;  %v696_v53 = vpack.c.bf16 %v1102_v30, %v1100_v29 }
  0x3a   :  { %721 = vmatprep.subr.bf16.mxu1 %v720_v57  ;;  %1352 = vst [vmem:[#allocation22_spill] sm:$0xff] %v1105_v38  ;;  %1353 = vst [vmem:[#allocation23_spill] sm:$0xff] %v1107_v39  ;;  %v1112_v51 = vld [vmem:[#allocation2 + $0x60] sm:$0xff]  ;;  %v1118_v57 = vld [vmem:[#allocation2 + $0x68] sm:$0xff] }
  0x3b   :  { %v1120_v63 = vld [vmem:[#allocation2 + $0x160] sm:$0xff]  ;;  %v1124_v16 = vld [vmem:[#allocation2 + $0x168] sm:$0xff]  ;;  %v1126_v12 = vld [vmem:[#allocation2 + $0xf0] sm:$0xff] }
  0x3c   :  { %691 = vmatpush3.bf16.msra.mxu0 %v690_v3  ;;  %1354 = vst [vmem:[#allocation24_spill] sm:$0xff] %v1120_v63  ;;  %v111_v62 = vld [vmem:[#allocation5] sm:$0xf]  ;;  %v728_v3 = vpack.c.bf16 %v1107_v39, %v1105_v38  ;;  %1355 = vst [vmem:[#allocation25_spill] sm:$0xff] %v1124_v16  ;;  %v1132_v25 = vld [vmem:[#allocation2 + $0x1f0] sm:$0xff]  ;;  %v294_v39 = vmul.f32 %v960_v1, %v960_v1  ;;  %v698_v38 = vpack.c.bf16 %v1118_v57, %v1112_v51 }
  0x3d   :  { %723 = vmatpush3.bf16.msra.mxu1 %v722_v7  ;;  %693 = vmatprep.subr.bf16.mxu0 %v692_v8  ;;  %1356 = vst [vmem:[#allocation26_spill] sm:$0xff] %v1126_v12  ;;  %v1128_v7 = vld [vmem:[#allocation2 + $0xf8] sm:$0xff]  ;;  %v1130_v8 = vrot.slane %v111_v62, %v120_v34  ;;  %1358 = vst [vmem:[#allocation28_spill] sm:$0xff] %v1132_v25  ;;  %v1136_v29 = vrot.slane %v111_v62, %v128_v43  ;;  %v1149_v17 = vld [vmem:[#allocation2 + $0x70] sm:$0xff] }
  0x3e   :  { %725 = vmatprep.subr.bf16.mxu1 %v724_v21  ;;  %1357 = vst [vmem:[#allocation27_spill] sm:$0xff] %v1128_v7  ;;  %v1134_v30 = vld [vmem:[#allocation2 + $0x1f8] sm:$0xff]  ;;  %v293_v21 = vmul.f32 %v958_v0, %v958_v0  ;;  %v730_v34 = vpack.c.bf16 %v1124_v16, %v1120_v63  ;;  %v700_v43 = vpack.c.bf16 %v1128_v7, %v1126_v12  ;;  %v116_v7 = vsub.s32 0, %v1078_v61 }
  0x3f   :  { %1359 = vst [vmem:[#allocation29_spill] sm:$0xff] %v1134_v30  ;;  %198 = vmatprep.mubr.f32.mxu0 %v1130_v8  ;;  %v1151_v0 = vld [vmem:[#allocation2 + $0x78] sm:$0xff]  ;;  %v325_v1 = vmul.f32 %v962_v2, %v962_v2  ;;  %268 = vmatprep.mubr.f32.mxu1 %v1136_v29  ;;  %v277_v12 = vmul.f32 %v968_v5, %v968_v5 }
  0x40   :  { %695 = vmatpush3.bf16.msra.mxu0 %v694_v47  ;;  %v326_v47 = vmul.f32 %v966_v4, %v966_v4  ;;  %v1161_v16 = vld [vmem:[#allocation2 + $0x178] sm:$0xff]  ;;  %v278_v2 = vmul.f32 %v970_v6, %v970_v6  ;;  %v309_v4 = vmul.f32 %v976_v9, %v976_v9  ;;  %v736_v63 = vpack.c.bf16 %v294_v39, %v293_v21 }
  0x41   :  { %727 = vmatpush3.bf16.msra.mxu1 %v726_v52  ;;  %697 = vmatprep.subr.bf16.mxu0 %v696_v53  ;;  %v732_v52 = vpack.c.bf16 %v1134_v30, %v1132_v25  ;;  %v1159_v53 = vld [vmem:[#allocation2 + $0x170] sm:$0xff]  ;;  %v702_v30 = vpack.c.bf16 %v1151_v0, %v1149_v17  ;;  %v124_v25 = vsub.s32 2, %v1078_v61  ;;  %v295_v6 = vmul.f32 %v980_v11, %v980_v11 }
  0x42   :  { %729 = vmatprep.subr.bf16.mxu1 %v728_v3  ;;  %v310_v3 = vmul.f32 %v978_v10, %v978_v10  ;;  %v734_v5 = vpack.c.bf16 %v1161_v16, %v1159_v53  ;;  %v296_v9 = vmul.f32 %v984_v13, %v984_v13  ;;  %v768_v10 = vpack.c.bf16 %v326_v47, %v325_v1 }
  0x43   :  { %v328_v61 = vmul.f32 %v988_v15, %v988_v15  ;;  %v738_v39 = vpack.c.bf16 %v278_v2, %v277_v12  ;;  %v280_v11 = vmul.f32 %v996_v19, %v996_v19  ;;  %v311_v13 = vmul.f32 %v998_v20, %v998_v20 }
  0x44   :  { %699 = vmatpush3.bf16.msra.mxu0 %v698_v38  ;;  %v327_v38 = vmul.f32 %v986_v14, %v986_v14  ;;  %v770_v21 = vpack.c.bf16 %v310_v3, %v309_v4  ;;  %v312_v1 = vmul.f32 %v1002_v22, %v1002_v22  ;;  %v1196_v14 = vrot.slane %v111_v62, %v124_v25 }
  0x45   :  { %731 = vmatpush3.bf16.msra.mxu1 %v730_v34  ;;  %701 = vmatprep.subr.bf16.mxu0 %v700_v43  ;;  %v279_v34 = vmul.f32 %v994_v18, %v994_v18  ;;  %v1188_v43 = vrot.slane %v111_v62, %v116_v7  ;;  %v740_v15 = vpack.c.bf16 %v296_v9, %v295_v6  ;;  %v1361_v6 = vld [vmem:[#allocation15_spill] sm:$0xff]  ;;  %v1362_v9 = vld [vmem:[#allocation16_spill] sm:$0xff] }
  0x46   :  { %733 = vmatprep.subr.bf16.mxu1 %v732_v52  ;;  %v297_v18 = vmul.f32 %v1004_v23, %v1004_v23  ;;  %v298_v12 = vmul.f32 %v1006_v24, %v1006_v24  ;;  %v772_v19 = vpack.c.bf16 %v328_v61, %v327_v38  ;;  %v329_v20 = vmul.f32 %v1010_v26, %v1010_v26  ;;  %v1363_v38 = vld [vmem:[#allocation17_spill] sm:$0xff] }
  0x47   :  { %v330_v22 = vmul.f32 %v1012_v27, %v1012_v27  ;;  %v281_v62 = vmul.f32 %v1014_v28, %v1014_v28  ;;  %v313_v23 = vmul.f32 %v1022_v32, %v1022_v32  ;;  %v314_v24 = vmul.f32 %v1024_v33, %v1024_v33 }
  0x48   :  { %703 = vmatpush3.bf16.msra.mxu0 %v702_v30  ;;  %v742_v26 = vpack.c.bf16 %v280_v11, %v279_v34  ;;  %v774_v25 = vpack.c.bf16 %v312_v1, %v311_v13  ;;  %v744_v27 = vpack.c.bf16 %v298_v12, %v297_v18  ;;  %v299_v28 = vmul.f32 %v1028_v35, %v1028_v35  ;;  %v1366_v1 = vld [vmem:[#allocation20_spill] sm:$0xff]  ;;  %v1367_v18 = vld [vmem:[#allocation21_spill] sm:$0xff] }
  0x49   :  { %735 = vmatpush3.bf16.msra.mxu1 %v734_v5  ;;  %737 = vmatprep.subr.bf16.mxu0 %v736_v63  ;;  %v282_v63 = vmul.f32 %v1020_v31, %v1020_v31  ;;  %v300_v31 = vmul.f32 %v1030_v36, %v1030_v36  ;;  %v776_v32 = vpack.c.bf16 %v330_v22, %v329_v20  ;;  %v1360_v5 = vld [vmem:[#allocation14_spill] sm:$0xff] }
  0x4a   :  { %769 = vmatprep.subr.bf16.mxu1 %v768_v10  ;;  %v331_v30 = vmul.f32 %v1032_v37, %v1032_v37  ;;  %v332_v33 = vmul.f32 %v1038_v40, %v1038_v40  ;;  %v283_v7 = vmul.f32 %v1040_v41, %v1040_v41  ;;  %v284_v47 = vmul.f32 %v1042_v42, %v1042_v42  ;;  %v1368_v20 = vld [vmem:[#allocation22_spill] sm:$0xff] }
  0x4b   :  { %199 = vmatmul.mubr.f32.vlgmr.msra.gmra.mrb[0].mxu0 %v1188_v43  ;;  %v315_v35 = vmul.f32 %v1046_v44, %v1046_v44  ;;  %v316_v36 = vmul.f32 %v1048_v45, %v1048_v45  ;;  %v746_v37 = vpack.c.bf16 %v282_v63, %v281_v62  ;;  %v778_v52 = vpack.c.bf16 %v314_v24, %v313_v23  ;;  %v1369_v62 = vld [vmem:[#allocation23_spill] sm:$0xff] }
  0x4c   :  { %269 = vmatmul.mubr.f32.vlgmr.msra.gmra.mrb[0].mxu1 %v1196_v14  ;;  %739 = vmatpush3.bf16.msra.mxu0 %v738_v39  ;;  %v748_v40 = vpack.c.bf16 %v300_v31, %v299_v28  ;;  %v301_v41 = vmul.f32 %v1050_v46, %v1050_v46  ;;  %v302_v42 = vmul.f32 %v1052_v48, %v1052_v48  ;;  %v1364_v39 = vld [vmem:[#allocation18_spill] sm:$0xff] }
  0x4d   :  { %771 = vmatpush3.bf16.msra.mxu1 %v770_v21  ;;  %741 = vmatprep.subr.bf16.mxu0 %v740_v15  ;;  %v333_v44 = vmul.f32 %v1054_v49, %v1054_v49  ;;  %v334_v45 = vmul.f32 %v1056_v50, %v1056_v50  ;;  %v286_v2 = vmul.f32 %v1066_v55, %v1066_v55  ;;  %v1365_v21 = vld [vmem:[#allocation19_spill] sm:$0xff] }
  0x4e   :  { %773 = vmatprep.subr.bf16.mxu1 %v772_v19  ;;  %405 = vmatprep.mubr.f32.mxu0 %v1130_v8  ;;  %v285_v8 = vmul.f32 %v1064_v54, %v1064_v54  ;;  %v317_v46 = vmul.f32 %v1068_v56, %v1068_v56  ;;  %v318_v48 = vmul.f32 %v1072_v58, %v1072_v58 }
  0x4f   :  { %475 = vmatprep.mubr.f32.mxu1 %v1136_v29  ;;  %v780_v29 = vpack.c.bf16 %v332_v33, %v331_v30  ;;  %v750_v4 = vpack.c.bf16 %v284_v47, %v283_v7  ;;  %v782_v3 = vpack.c.bf16 %v316_v36, %v315_v35  ;;  %v752_v49 = vpack.c.bf16 %v302_v42, %v301_v41  ;;  %v1372_v33 = vld [vmem:[#allocation26_spill] sm:$0xff]  ;;  %v1373_v47 = vld [vmem:[#allocation27_spill] sm:$0xff]  ;;  %v1374_v35 = vld [vmem:[#allocation28_spill] sm:$0xff] }
  0x50   :  { %743 = vmatpush3.bf16.msra.mxu0 %v742_v26  ;;  %v303_v50 = vmul.f32 %v1074_v59, %v1074_v59  ;;  %v304_v54 = vmul.f32 %v1076_v60, %v1076_v60  ;;  %v784_v55 = vpack.c.bf16 %v334_v45, %v333_v44  ;;  %v335_v56 = vmul.f32 %v1360_v5, %v1360_v5  ;;  %v1370_v26 = vld [vmem:[#allocation24_spill] sm:$0xff] }
  0x51   :  { %775 = vmatpush3.bf16.msra.mxu1 %v774_v25  ;;  %745 = vmatprep.subr.bf16.mxu0 %v744_v27  ;;  %v336_v58 = vmul.f32 %v1361_v6, %v1361_v6  ;;  %v287_v10 = vmul.f32 %v1362_v9, %v1362_v9  ;;  %v288_v61 = vmul.f32 %v1363_v38, %v1363_v38  ;;  %v1371_v27 = vld [vmem:[#allocation25_spill] sm:$0xff] }
  0x52   :  { %777 = vmatprep.subr.bf16.mxu1 %v776_v32  ;;  %v319_v59 = vmul.f32 %v1364_v39, %v1364_v39  ;;  %v320_v60 = vmul.f32 %v1365_v21, %v1365_v21  ;;  %v754_v34 = vpack.c.bf16 %v286_v2, %v285_v8  ;;  %v786_v11 = vpack.c.bf16 %v318_v48, %v317_v46 }
  0x53   :  { %v756_v13 = vpack.c.bf16 %v304_v54, %v303_v50  ;;  %v305_v15 = vmul.f32 %v1366_v1, %v1366_v1  ;;  %v306_v12 = vmul.f32 %v1367_v18, %v1367_v18  ;;  %v788_v19 = vpack.c.bf16 %v336_v58, %v335_v56 }
  0x54   :  { %747 = vmatpush3.bf16.msra.mxu0 %v746_v37  ;;  %v337_v22 = vmul.f32 %v1368_v20, %v1368_v20  ;;  %v338_v63 = vmul.f32 %v1369_v62, %v1369_v62  ;;  %v289_v23 = vmul.f32 %v1112_v51, %v1112_v51  ;;  %v290_v24 = vmul.f32 %v1118_v57, %v1118_v57  ;;  %v1375_v37 = vld [vmem:[#allocation29_spill] sm:$0xff] }
  0x55   :  { %779 = vmatpush3.bf16.msra.mxu1 %v778_v52  ;;  %749 = vmatprep.subr.bf16.mxu0 %v748_v40  ;;  %v321_v25 = vmul.f32 %v1370_v26, %v1370_v26  ;;  %v322_v28 = vmul.f32 %v1371_v27, %v1371_v27  ;;  %v758_v31 = vpack.c.bf16 %v288_v61, %v287_v10 }
  0x56   :  { %781 = vmatprep.subr.bf16.mxu1 %v780_v29  ;;  %v790_v32 = vpack.c.bf16 %v320_v60, %v319_v59  ;;  %v760_v30 = vpack.c.bf16 %v306_v12, %v305_v15  ;;  %v307_v7 = vmul.f32 %v1372_v33, %v1372_v33  ;;  %v308_v51 = vmul.f32 %v1373_v47, %v1373_v47 }
  0x57   :  { %v792_v57 = vpack.c.bf16 %v338_v63, %v337_v22  ;;  %v339_v36 = vmul.f32 %v1374_v35, %v1374_v35  ;;  %v340_v52 = vmul.f32 %v1375_v37, %v1375_v37  ;;  %v291_v40 = vmul.f32 %v1149_v17, %v1149_v17 }
  0x58   :  { %751 = vmatpush3.bf16.msra.mxu0 %v750_v4  ;;  %v292_v41 = vmul.f32 %v1151_v0, %v1151_v0  ;;  %v323_v42 = vmul.f32 %v1159_v53, %v1159_v53  ;;  %v762_v29 = vpack.c.bf16 %v290_v24, %v289_v23  ;;  %v324_v44 = vmul.f32 %v1161_v16, %v1161_v16 }
  0x59   :  { %783 = vmatpush3.bf16.msra.mxu1 %v782_v3  ;;  %753 = vmatprep.subr.bf16.mxu0 %v752_v49  ;;  %v794_v45 = vpack.c.bf16 %v322_v28, %v321_v25  ;;  %v764_v8 = vpack.c.bf16 %v308_v51, %v307_v7  ;;  %v796_v2 = vpack.c.bf16 %v340_v52, %v339_v36  ;;  %v911_v0 = vmov 0.0  }
  0x5a   :  { %785 = vmatprep.subr.bf16.mxu1 %v784_v55  ;;  %v766_v46 = vpack.c.bf16 %v292_v41, %v291_v40  ;;  %v798_v17 = vpack.c.bf16 %v324_v44, %v323_v42  ;;  %45 = vst [vmem:[#allocation7] sm:$0x1] %v911_v0  ;;  %46 = vst [vmem:[#allocation8] sm:$0x1] %v911_v0 }
  0x5c   :  { %755 = vmatpush3.bf16.msra.mxu0 %v754_v34 }
  0x5d   :  { %787 = vmatpush3.bf16.msra.mxu1 %v786_v11  ;;  %757 = vmatprep.subr.bf16.mxu0 %v756_v13 }
  0x5e   :  { %789 = vmatprep.subr.bf16.mxu1 %v788_v19 }
  0x60   :  { %759 = vmatpush3.bf16.msra.mxu0 %v758_v31 }
  0x61   :  { %791 = vmatpush3.bf16.msra.mxu1 %v790_v32  ;;  %761 = vmatprep.subr.bf16.mxu0 %v760_v30  ;;  %v112_v50 = vld [vmem:[#allocation7] sm:$0x1] }
  0x62   :  { %793 = vmatprep.subr.bf16.mxu1 %v792_v57 }
  0x64   :  { %763 = vmatpush3.bf16.msra.mxu0 %v762_v29 }
  0x65   :  { %795 = vmatpush3.bf16.msra.mxu1 %v794_v45  ;;  %765 = vmatprep.subr.bf16.mxu0 %v764_v8 }
  0x66   :  { %797 = vmatprep.subr.bf16.mxu1 %v796_v2 }
  0x68   :  { %767 = vmatpush3.bf16.msra.mxu0 %v766_v46 }
  0x69   :  { %799 = vmatpush3.bf16.msra.mxu1 %v798_v17 }
  0x6b   :  { %406 = vmatmul.mubr.f32.vlgmr.msra.gmra.mrb[2].mxu0 %v1188_v43 }
  0x6c   :  { %476 = vmatmul.mubr.f32.vlgmr.msra.gmra.mrb[2].mxu1 %v1196_v14 }
 0x11e   :  { %v564_v16 = vpop.f32.mrb[0].mxu0 }
 0x11f   :  { %v599_v53 = vpop.f32.mrb[0].mxu1  ;;  %v565_v48 = vpop.f32.mrb[1].mxu0 }
 0x120   :  { %v566_v4 = vadd.f32 %v565_v48, %v564_v16  ;;  %v600_v3 = vpop.f32.mrb[1].mxu1 }
 0x121   :  { %v601_v49 = vadd.f32 %v600_v3, %v599_v53 }
 0x123   :  { %v271_v54 = vadd.f32 %v601_v49, %v566_v4 }
 0x125   :  { %v274_v55 = vadd.f32 %v271_v54, %v112_v50 }
 0x127   :  { %275 = vst [vmem:[#allocation7] sm:$0x1] %v274_v55 }
 0x128   :  { %866 = shalt.err (!%p863_p6)
}
 0x129   :  { %s867_s15 = scalar_lea.hbm %s1326_s2, 16 }
 0x12a   :  { %p868_p7 = scmp.ne.s32.totalorder %s1326_s2, %s867_s15  ;;  %p871_p8 = scmp.lt.u32.totalorder %s867_s15, %s1326_s2 }
 0x12c   :  { %p873_p9 = pnand %p871_p8, %p868_p7 }
 0x12e   :  { %876 = shalt.err (!%p873_p9)
}
 0x12f   :  { %511 = dma.vmem_to_hbm [thread:$0]  %s509_s10, 16, %s1326_s2, [#allocation4]   ;;  %v276_v9 = vld [vmem:[#allocation8] sm:$0x1]  ;;  %v486_v61 = vld [vmem:[#allocation7] sm:$0x1] }
 0x130   :  { %v488_v39 = vmul.f32 %v486_v61, %v486_v61  ;;  %s913_s2 = smov [#allocation8]  }
 0x131   :  { %s518_s22 = sshll.u32 %s913_s2, 4  ;;  %s519_s22 = int_to_ptr.vmem [resolvable:$true] %s518_s22 }
 0x132   :  { %s877_s23 = scalar_lea.vmem %s519_s22, 16  ;;  %s881_s24 = scalar_lea.vmem %s519_s22, 32 }
 0x133   :  { %p878_p10 = scmp.ne.s32.totalorder %s519_s22, %s877_s23  ;;  %p882_p11 = scmp.lt.s32.totalorder %s519_s22, %s519_s22 }
 0x134   :  { %p883_p12 = scmp.lt.s32.totalorder %s881_s24, %s877_s23 }
 0x136   :  { %p884_p13 = por %p883_p12, %p882_p11 }
 0x138   :  { %p885_p0 = pnand %p884_p13, %p878_p10 }
 0x13e   :  { %v634_v43 = vpop.f32.mrb[2].mxu0 }
 0x13f   :  { %v669_v14 = vpop.f32.mrb[2].mxu1  ;;  %v635_v5 = vpop.f32.mrb[3].mxu0 }
 0x140   :  { %v636_v56 = vadd.f32 %v635_v5, %v634_v43  ;;  %v670_v6 = vpop.f32.mrb[3].mxu1 }
 0x141   :  { %v671_v58 = vadd.f32 %v670_v6, %v669_v14 }
 0x143   :  { %v478_v10 = vadd.f32 %v671_v58, %v636_v56 }
 0x145   :  { %v481_v38 = vadd.f32 %v478_v10, %v276_v9 }
 0x147   :  { %482 = vst [vmem:[#allocation8] sm:$0x1] %v481_v38 }
 0x14e   :  { %v487_v59 = vld [vmem:[#allocation8] sm:$0x1] }
 0x14f   :  { %v489_v21 = vsub.f32 %v487_v59, %v488_v39 }
 0x151   :  { %v490_v60 = vmax.f32 %v489_v21, 0.0 }
 0x153   :  { %v491_v34 = vadd.f32 1e-06, %v490_v60 }
 0x155   :  { %807 = vrsqrt.f32 %v491_v34  ;;  %vm494_vm0 = vcmp.eq.f32.partialorder %v491_v34, inf  ;;  %v497_v1 = vand.u32 2147483648, %v491_v34  ;;  %vm496_vm1 = vcmp.eq.f32.partialorder %v491_v34, 0.0 }
 0x15f   :  { %v808_v11 = vpop.eup %807 }
 0x160   :  { %v493_v13 = vmul.f32 %v808_v11, %v491_v34 }
 0x162   :  { %v495_v15 = vsel %vm494_vm0, %v491_v34, %v493_v13 }
 0x163   :  { %v498_v18 = vsel %vm496_vm1, %v497_v1, %v495_v15 }
 0x164   :  { %809 = vrcp.f32 %v498_v18 }
 0x16e   :  { %v810_v12 = vpop.eup %809 }
 0x16f   :  { %501 = vst [vmem:[#allocation8] sm:$0x1] %v810_v12 }
 0x170   :  { %888 = shalt.err (!%p885_p0)
}
 0x171   :  { %s889_s27 = scalar_lea.hbm %s1327_s3, 16 }
 0x172   :  { %p890_p1 = scmp.ne.s32.totalorder %s1327_s3, %s889_s27  ;;  %p893_p2 = scmp.lt.u32.totalorder %s889_s27, %s1327_s3 }
 0x174   :  { %p895_p3 = pnand %p893_p2, %p890_p1 }
 0x176   :  { %898 = shalt.err (!%p895_p3)
}
 0x177   :  { %521 = dma.vmem_to_hbm [thread:$0]  %s519_s22, 16, %s1327_s3, [#allocation9]  }
 0x178   :  { %903 = dma.done.wait [#allocation4], 16  }
 0x179   :  { %904 = vsyncadd [#allocation4], 4294967280 }
 0x17a   :  { %905 = dma.done.wait [#allocation9], 16  }
 0x17b   :  { %906 = vsyncadd [#allocation9], 4294967280 }
 0x17c   :  { %528 = vsyncpa [#allocation3], 1 }
 0x17d   :  { %529 = vsyncpa [#allocation6], 1 }
 0x17e   :  { %530 = vsyncpa [#allocation4], 1 }
 0x17f   :  { %531 = vsyncpa [#allocation9], 1 }

</bundles_post_ra>
